<compile_context>
chip_gen: v7x
topology: tpu7x:2x2x1
jax: 0.10.0
libtpu: 0.0.40
codegen_flags: <defaults>
</compile_context>

<pallas_src>
import jax
import jax.numpy as jnp
from jax.experimental import pallas as pl
from jax.experimental.pallas import tpu as pltpu


def aspect_kernel(inv_ref, emb_ref, embn_ref, w_ref, wwt_ref, bw_ref, wtt_ref,
                  out_ref):
    """One grid step processes TB batch rows.

    inv_ref : (TB, 2)    f32  [1/len_x, 1/len_n]  (precomputed in wrapper)
    emb_ref : (TB, L, E) f32  gathered embeddings of x
    embn_ref: (TB, Ln,E) f32  gathered embeddings of ngt
    w_ref   : (E, E)     trans_matrix.weight (used as y @ W == W^T y)
    wwt_ref : (E, K)     w_trans_matrix.weight^T
    bw_ref  : (1, K)     w_trans_matrix.bias
    wtt_ref : (K, E)     t_trans_matrix.weight^T
    out_ref : (TB, 2E+K) packed [out | y_n | p], single lane-dense store
    """
    emb = emb_ref[...]
    embn = embn_ref[...]
    inv = inv_ref[...]
    inv_x = inv[:, 0:1]                                   # (TB, 1)
    inv_n = inv[:, 1:2]                                   # (TB, 1)

    # mean pools: reciprocal lengths precomputed -> multiply, no divide
    y = jnp.sum(emb, axis=1) * inv_x                      # (TB, E)
    y_n = jnp.sum(embn, axis=1) * inv_n                   # (TB, E)

    # reassociated attention score:
    #   s[b,l] = (emb[b,l] @ W^T) . y[b] = emb[b,l] . (y[b] @ W)
    q = jnp.dot(y, w_ref[...], preferred_element_type=jnp.float32)   # (TB, E)
    s = jnp.sum(emb * q[:, None, :], axis=2)              # (TB, L)  lane-major

    # softmax over L on the lane axis (matches torch softmax over seq)
    m = jnp.max(s, axis=1, keepdims=True)
    e = jnp.exp(s - m)
    att = e * pl.reciprocal(jnp.sum(e, axis=1, keepdims=True), approx=True)

    # attention-weighted sum of embeddings
    emb_v = jnp.sum(att[:, :, None] * emb, axis=1)        # (TB, E)

    # AutoEnc: Linear(E->K) + softmax + Linear(K->E, no bias)
    h = jnp.dot(emb_v, wwt_ref[...],
                preferred_element_type=jnp.float32) + bw_ref[...]    # (TB, K)
    mh = jnp.max(h, axis=1, keepdims=True)
    eh = jnp.exp(h - mh)
    p = eh * pl.reciprocal(jnp.sum(eh, axis=1, keepdims=True), approx=True)
    out = jnp.dot(p, wtt_ref[...], preferred_element_type=jnp.float32)  # (TB, E)

    # single packed store: [out | y_n | p]
    out_ref[...] = jnp.concatenate([out, y_n, p], axis=-1)


def aspect_extrac(x, ngt, emb_table, w_trans, w_w, b_w, w_t, lambda_,
                  block_b=None):
    """x, ngt: (B, L)/(B, Ln) int32; emb_table: (V, E); w_trans: (E, E);
    w_w: (K, E); b_w: (K,); w_t: (E, K); lambda_: python float."""
    B, L = x.shape
    _, Ln = ngt.shape
    _, E = emb_table.shape
    K, _ = w_w.shape

    # --- glue in plain JAX: embedding gather + length reciprocals ----------
    # TODO(synk): for E >= 128, move the gather in-kernel (scalar-prefetched
    # token ids + pl.Element row gathers) to avoid re-reading (B,L,E) from HBM.
    emb = jnp.take(emb_table, x, axis=0).astype(jnp.float32)       # (B, L, E)
    emb_n = jnp.take(emb_table, ngt, axis=0).astype(jnp.float32)   # (B, Ln, E)
    len_x = jnp.sum(x != 1, axis=1).astype(jnp.float32)
    len_n = jnp.sum(ngt != 1, axis=1).astype(jnp.float32)
    # no all-pad guard: matches the PyTorch module (div-by-zero -> inf there too)
    inv = jnp.stack([1.0 / len_x, 1.0 / len_n], axis=1)            # (B, 2)

    # --- batch tiling: TB rows per grid step --------------------------------
    if block_b is None:
        # TB*L = 256 at L=8 for v6e/v7x MXU shape; keeps per-step VMEM tiny
        # (well under v7x's 64 MiB), and TB is a multiple of 8 when B is padded.
        block_b = B if B <= 32 else 32
    Bp = ((B + block_b - 1) // block_b) * block_b
    if Bp != B:
        pad = Bp - B
        emb = jnp.pad(emb, ((0, pad), (0, 0), (0, 0)))
        emb_n = jnp.pad(emb_n, ((0, pad), (0, 0), (0, 0)))
        inv = jnp.pad(inv, ((0, pad), (0, 0)), constant_values=1.0)

    packed = pl.pallas_call(
        aspect_kernel,
        out_shape=jax.ShapeDtypeStruct((Bp, 2 * E + K), jnp.float32),
        grid=(Bp // block_b,),
        in_specs=[
            pl.BlockSpec((block_b, 2), lambda b: (b, 0)),        # 1/len scalars
            pl.BlockSpec((block_b, L, E), lambda b: (b, 0, 0)),  # emb
            pl.BlockSpec((block_b, Ln, E), lambda b: (b, 0, 0)), # emb_n
            pl.BlockSpec((E, E), lambda b: (0, 0)),              # W (resident)
            pl.BlockSpec((E, K), lambda b: (0, 0)),              # Ww^T
            pl.BlockSpec((1, K), lambda b: (0, 0)),              # bw
            pl.BlockSpec((K, E), lambda b: (0, 0)),              # Wt^T
        ],
        out_specs=pl.BlockSpec((block_b, 2 * E + K), lambda b: (b, 0)),
        compiler_params=pltpu.CompilerParams(
            dimension_semantics=("parallel",)),                  # v7x: 2 TCs
    )(inv, emb, emb_n, w_trans, w_w.T, b_w.reshape(1, K), w_t.T)

    packed = packed[:B]
    out = packed[:, :E]
    y_n = packed[:, E:2 * E]
    p = packed[:, 2 * E:]

    # reg_turn: weight-only, batch-independent scalar -> plain JAX glue.
    t_matrix = w_t.T                                               # (K, E)
    t_n = t_matrix / jnp.maximum(
        jnp.linalg.norm(t_matrix, axis=1, keepdims=True), 1e-12)
    reg_turn = lambda_ * jnp.linalg.norm(
        t_n @ t_n.T - jnp.eye(K, dtype=jnp.float32))

    return out, y_n, reg_turn, p


def reference(x, ngt, emb_table, w_trans, w_w, b_w, w_t, lambda_):
    """Pure-JAX reference matching the PyTorch Aspect_Extrac forward."""
    emb = emb_table[x]
    emb_n = emb_table[ngt]
    len_x = (x != 1).sum(axis=1)
    len_n = (ngt != 1).sum(axis=1)
    y = emb.sum(axis=1) / len_x[:, None]
    y_n = emb_n.sum(axis=1) / len_n[:, None]
    trans = emb @ w_trans.T
    d = jnp.einsum('ble,be->bl', trans, y)
    att = jax.nn.softmax(d, axis=-1)
    emb_v = jnp.einsum('bl,ble->be', att, emb)
    h = emb_v @ w_w.T + b_w
    p = jax.nn.softmax(h, axis=-1)
    out = p @ w_t.T
    t_matrix = w_t.T
    t_n = t_matrix / jnp.maximum(
        jnp.linalg.norm(t_matrix, axis=1, keepdims=True), 1e-12)
    reg = lambda_ * jnp.linalg.norm(
        t_n @ t_n.T - jnp.eye(t_matrix.shape[0], dtype=jnp.float32))
    return out, y_n, reg, p


if __name__ == "__main__":
    B, L, Ln, V, E, K = 2, 8, 8, 32, 32, 16
    lambda_ = 0.5
    key = jax.random.PRNGKey(0)
    k1, k2, k3, k4, k5, k6, k7 = jax.random.split(key, 7)

    # deterministic parameters (frozen embedding table + the three linears)
    emb_table = jax.random.normal(k1, (V, E), dtype=jnp.float32)
    w_trans = jax.random.normal(k2, (E, E), dtype=jnp.float32) * 0.1   # (E,E)
    w_w = jax.random.normal(k5, (K, E), dtype=jnp.float32) * 0.1       # (K,E)
    b_w = jax.random.normal(k6, (K,), dtype=jnp.float32) * 0.1         # (K,)
    w_t = jax.random.normal(k7, (E, K), dtype=jnp.float32) * 0.1       # (E,K)

    # token ids with pad id 1 at the tail of each sequence
    lens_x = jnp.array([5, 7])
    lens_n = jnp.array([6, 4])
    pos = jnp.arange(L)[None, :]
    pos_n = jnp.arange(Ln)[None, :]
    tok_x = jax.random.randint(k3, (B, L), 2, V)
    tok_n = jax.random.randint(k4, (B, Ln), 2, V)
    x = jnp.where(pos < lens_x[:, None], tok_x, 1).astype(jnp.int32)
    ngt = jnp.where(pos_n < lens_n[:, None], tok_n, 1).astype(jnp.int32)

    out, y_n, reg, p = aspect_extrac(x, ngt, emb_table, w_trans, w_w, b_w,
                                     w_t, lambda_)
    jax.block_until_ready((out, y_n, reg, p))

    r_out, r_yn, r_reg, r_p = reference(x, ngt, emb_table, w_trans, w_w, b_w,
                                        w_t, lambda_)
    assert out.shape == (B, E) and y_n.shape == (B, E) and p.shape == (B, K)
    # tolerance loosened slightly for pl.reciprocal(approx=True) in the softmaxes
    assert jnp.allclose(out, r_out, atol=5e-3, rtol=5e-3)
    assert jnp.allclose(y_n, r_yn, atol=1e-5, rtol=1e-5)
    assert jnp.allclose(p, r_p, atol=5e-3, rtol=5e-3)
    assert jnp.allclose(reg, r_reg, atol=1e-5, rtol=1e-5)
    print("KERNEL_OK")
</pallas_src>

<mosaic_0001>
module attributes {stable_mosaic.version = 11 : i64} {
  func.func @aspect_kernel(%arg0: i32, %arg1: memref<2x2xf32, #tpu.memory_space<vmem>>, %arg2: memref<2x8x32xf32, #tpu.memory_space<vmem>>, %arg3: memref<2x8x32xf32, #tpu.memory_space<vmem>>, %arg4: memref<32x32xf32, #tpu.memory_space<vmem>>, %arg5: memref<32x16xf32, #tpu.memory_space<vmem>>, %arg6: memref<1x16xf32, #tpu.memory_space<vmem>>, %arg7: memref<16x32xf32, #tpu.memory_space<vmem>>, %arg8: memref<2x80xf32, #tpu.memory_space<vmem>>) attributes {dimension_semantics = [#tpu.dimension_semantics<parallel>], iteration_bounds = array<i64: 1>, scalar_prefetch = 0 : i64, scratch_operands = 0 : i64, tpu.core_type = #tpu.core_type<tc>, window_params = [{transform_indices = @transform_0, window_bounds = array<i64: 2, 2>}, {transform_indices = @transform_1, window_bounds = array<i64: 2, 8, 32>}, {transform_indices = @transform_2, window_bounds = array<i64: 2, 8, 32>}, {pipeline_mode = #tpu.pipeline_mode<synchronous>, transform_indices = @transform_3, window_bounds = array<i64: 32, 32>}, {pipeline_mode = #tpu.pipeline_mode<synchronous>, transform_indices = @transform_4, window_bounds = array<i64: 32, 16>}, {pipeline_mode = #tpu.pipeline_mode<synchronous>, transform_indices = @transform_5, window_bounds = array<i64: 1, 16>}, {pipeline_mode = #tpu.pipeline_mode<synchronous>, transform_indices = @transform_6, window_bounds = array<i64: 16, 32>}, {transform_indices = @transform_7, window_bounds = array<i64: 2, 80>}]} {
    %c0 = arith.constant 0 : index
    %c0_0 = arith.constant 0 : index
    %c0_1 = arith.constant 0 : index
    %0 = vector.load %arg2[%c0, %c0_0, %c0_1] : memref<2x8x32xf32, #tpu.memory_space<vmem>>, vector<2x8x32xf32>
    %c0_2 = arith.constant 0 : index
    %c0_3 = arith.constant 0 : index
    %c0_4 = arith.constant 0 : index
    %1 = vector.load %arg3[%c0_2, %c0_3, %c0_4] : memref<2x8x32xf32, #tpu.memory_space<vmem>>, vector<2x8x32xf32>
    %c0_5 = arith.constant 0 : index
    %c0_6 = arith.constant 0 : index
    %2 = vector.load %arg1[%c0_5, %c0_6] : memref<2x2xf32, #tpu.memory_space<vmem>>, vector<2x2xf32>
    %3 = vector.extract_strided_slice %2 {offsets = [0, 0], sizes = [2, 1], strides = [1, 1]} : vector<2x2xf32> to vector<2x1xf32>
    %4 = vector.extract_strided_slice %2 {offsets = [0, 1], sizes = [2, 1], strides = [1, 1]} : vector<2x2xf32> to vector<2x1xf32>
    %cst = arith.constant dense<0.000000e+00> : vector<2x32xf32>
    %5 = vector.multi_reduction <add>, %0, %cst [1] : vector<2x8x32xf32> to vector<2x32xf32>
    %6 = vector.broadcast %3 : vector<2x1xf32> to vector<2x32xf32>
    %7 = arith.mulf %5, %6 : vector<2x32xf32>
    %cst_7 = arith.constant dense<0.000000e+00> : vector<2x32xf32>
    %8 = vector.multi_reduction <add>, %1, %cst_7 [1] : vector<2x8x32xf32> to vector<2x32xf32>
    %9 = vector.broadcast %4 : vector<2x1xf32> to vector<2x32xf32>
    %10 = arith.mulf %8, %9 : vector<2x32xf32>
    %c0_8 = arith.constant 0 : index
    %c0_9 = arith.constant 0 : index
    %11 = vector.load %arg4[%c0_8, %c0_9] : memref<32x32xf32, #tpu.memory_space<vmem>>, vector<32x32xf32>
    %cst_10 = arith.constant dense<0.000000e+00> : vector<2x32xf32>
    %12 = tpu.matmul %7, %11, %cst_10 {dimension_numbers = #tpu.dot_dimension_numbers<[1], [0], [0], [1], [0, 0, 1, 1], [], []>} : vector<2x32xf32>, vector<32x32xf32>, vector<2x32xf32> -> vector<2x32xf32>
    %13 = vector.shape_cast %12 : vector<2x32xf32> to vector<2x1x32xf32>
    %14 = vector.broadcast %13 : vector<2x1x32xf32> to vector<2x8x32xf32>
    %15 = arith.mulf %0, %14 : vector<2x8x32xf32>
    %cst_11 = arith.constant dense<0.000000e+00> : vector<2x8xf32>
    %16 = vector.multi_reduction <add>, %15, %cst_11 [2] : vector<2x8x32xf32> to vector<2x8xf32>
    %cst_12 = arith.constant dense<0xFF800000> : vector<2xf32>
    %17 = vector.multi_reduction <maximumf>, %16, %cst_12 [1] : vector<2x8xf32> to vector<2xf32>
    %18 = vector.shape_cast %17 : vector<2xf32> to vector<2x1xf32>
    %19 = vector.broadcast %18 : vector<2x1xf32> to vector<2x8xf32>
    %20 = arith.subf %16, %19 : vector<2x8xf32>
    %21 = math.exp %20 : vector<2x8xf32>
    %cst_13 = arith.constant dense<0.000000e+00> : vector<2xf32>
    %22 = vector.multi_reduction <add>, %21, %cst_13 [1] : vector<2x8xf32> to vector<2xf32>
    %23 = vector.shape_cast %22 : vector<2xf32> to vector<2x1xf32>
    %24 = tpu.reciprocal %23 {approx = true} : vector<2x1xf32> -> vector<2x1xf32>
    %25 = vector.broadcast %24 : vector<2x1xf32> to vector<2x8xf32>
    %26 = arith.mulf %21, %25 : vector<2x8xf32>
    %27 = vector.shape_cast %26 : vector<2x8xf32> to vector<2x8x1xf32>
    %28 = vector.broadcast %27 : vector<2x8x1xf32> to vector<2x8x32xf32>
    %29 = arith.mulf %28, %0 : vector<2x8x32xf32>
    %cst_14 = arith.constant dense<0.000000e+00> : vector<2x32xf32>
    %30 = vector.multi_reduction <add>, %29, %cst_14 [1] : vector<2x8x32xf32> to vector<2x32xf32>
    %c0_15 = arith.constant 0 : index
    %c0_16 = arith.constant 0 : index
    %31 = vector.load %arg5[%c0_15, %c0_16] : memref<32x16xf32, #tpu.memory_space<vmem>>, vector<32x16xf32>
    %cst_17 = arith.constant dense<0.000000e+00> : vector<2x16xf32>
    %32 = tpu.matmul %30, %31, %cst_17 {dimension_numbers = #tpu.dot_dimension_numbers<[1], [0], [0], [1], [0, 0, 1, 1], [], []>} : vector<2x32xf32>, vector<32x16xf32>, vector<2x16xf32> -> vector<2x16xf32>
    %c0_18 = arith.constant 0 : index
    %c0_19 = arith.constant 0 : index
    %33 = vector.load %arg6[%c0_18, %c0_19] : memref<1x16xf32, #tpu.memory_space<vmem>>, vector<1x16xf32>
    %34 = vector.broadcast %33 : vector<1x16xf32> to vector<2x16xf32>
    %35 = arith.addf %32, %34 : vector<2x16xf32>
    %cst_20 = arith.constant dense<0xFF800000> : vector<2xf32>
    %36 = vector.multi_reduction <maximumf>, %35, %cst_20 [1] : vector<2x16xf32> to vector<2xf32>
    %37 = vector.shape_cast %36 : vector<2xf32> to vector<2x1xf32>
    %38 = vector.broadcast %37 : vector<2x1xf32> to vector<2x16xf32>
    %39 = arith.subf %35, %38 : vector<2x16xf32>
    %40 = math.exp %39 : vector<2x16xf32>
    %cst_21 = arith.constant dense<0.000000e+00> : vector<2xf32>
    %41 = vector.multi_reduction <add>, %40, %cst_21 [1] : vector<2x16xf32> to vector<2xf32>
    %42 = vector.shape_cast %41 : vector<2xf32> to vector<2x1xf32>
    %43 = tpu.reciprocal %42 {approx = true} : vector<2x1xf32> -> vector<2x1xf32>
    %44 = vector.broadcast %43 : vector<2x1xf32> to vector<2x16xf32>
    %45 = arith.mulf %40, %44 : vector<2x16xf32>
    %c0_22 = arith.constant 0 : index
    %c0_23 = arith.constant 0 : index
    %46 = vector.load %arg7[%c0_22, %c0_23] : memref<16x32xf32, #tpu.memory_space<vmem>>, vector<16x32xf32>
    %cst_24 = arith.constant dense<0.000000e+00> : vector<2x32xf32>
    %47 = tpu.matmul %45, %46, %cst_24 {dimension_numbers = #tpu.dot_dimension_numbers<[1], [0], [0], [1], [0, 0, 1, 1], [], []>} : vector<2x16xf32>, vector<16x32xf32>, vector<2x32xf32> -> vector<2x32xf32>
    %48 = tpu.concatenate %47, %10, %45 in 1 : vector<2x32xf32>, vector<2x32xf32>, vector<2x16xf32> -> vector<2x80xf32>
    %c0_25 = arith.constant 0 : index
    %c0_26 = arith.constant 0 : index
    %49 = vector.load %arg8[%c0_25, %c0_26] : memref<2x80xf32, #tpu.memory_space<vmem>>, vector<2x80xf32>
    tpu.vector_store %arg8[%c0_25, %c0_26], %48 {strides = array<i32>} : memref<2x80xf32, #tpu.memory_space<vmem>>, vector<2x80xf32>,
    return
  }
  func.func @transform_0(%arg0: i32) -> (i32, i32) {
    %c0_i32 = arith.constant 0 : i32
    %c0_i32_0 = arith.constant 0 : i32
    return %arg0, %c0_i32 : i32, i32
  }
  func.func @transform_1(%arg0: i32) -> (i32, i32, i32) {
    %c0_i32 = arith.constant 0 : i32
    %c0_i32_0 = arith.constant 0 : i32
    %c0_i32_1 = arith.constant 0 : i32
    return %arg0, %c0_i32, %c0_i32_0 : i32, i32, i32
  }
  func.func @transform_2(%arg0: i32) -> (i32, i32, i32) {
    %c0_i32 = arith.constant 0 : i32
    %c0_i32_0 = arith.constant 0 : i32
    %c0_i32_1 = arith.constant 0 : i32
    return %arg0, %c0_i32, %c0_i32_0 : i32, i32, i32
  }
  func.func @transform_3(%arg0: i32) -> (i32, i32) {
    %c0_i32 = arith.constant 0 : i32
    %c0_i32_0 = arith.constant 0 : i32
    %c0_i32_1 = arith.constant 0 : i32
    return %c0_i32, %c0_i32_0 : i32, i32
  }
  func.func @transform_4(%arg0: i32) -> (i32, i32) {
    %c0_i32 = arith.constant 0 : i32
    %c0_i32_0 = arith.constant 0 : i32
    %c0_i32_1 = arith.constant 0 : i32
    return %c0_i32, %c0_i32_0 : i32, i32
  }
  func.func @transform_5(%arg0: i32) -> (i32, i32) {
    %c0_i32 = arith.constant 0 : i32
    %c0_i32_0 = arith.constant 0 : i32
    %c0_i32_1 = arith.constant 0 : i32
    return %c0_i32, %c0_i32_0 : i32, i32
  }
  func.func @transform_6(%arg0: i32) -> (i32, i32) {
    %c0_i32 = arith.constant 0 : i32
    %c0_i32_0 = arith.constant 0 : i32
    %c0_i32_1 = arith.constant 0 : i32
    return %c0_i32, %c0_i32_0 : i32, i32
  }
  func.func @transform_7(%arg0: i32) -> (i32, i32) {
    %c0_i32 = arith.constant 0 : i32
    %c0_i32_0 = arith.constant 0 : i32
    return %arg0, %c0_i32 : i32, i32
  }
}

</mosaic_0001>

<bundles_post_ra>
// kernel: tpu_custom_call.1
= control target key start
LH: loop header
LB: loop body
LE: loop exit
PB: predicated region body
PF: predicated region fallthrough
CT: control target
= control target key end

     0   :  { %12 = vsyncpa [#allocation3], 0  ;;  %s854_s0 = inlined_call_operand.vmem [shape: f32[2,2], index: 0, kind: input, shape index: {}]   ;;  %s855_s1 = inlined_call_operand.vmem [shape: f32[2,8,32], index: 1, kind: input, shape index: {}]   ;;  %s856_s2 = inlined_call_operand.hbm [shape: f32[2,8,32], index: 2, kind: input, shape index: {}]   ;;  %s857_s3 = inlined_call_operand.vmem [shape: f32[32,32], index: 3, kind: input, shape index: {}]   ;;  %s858_s4 = inlined_call_operand.vmem [shape: f32[32,16], index: 4, kind: input, shape index: {}]   ;;  %s859_s5 = inlined_call_operand.hbm [shape: f32[1,16], index: 5, kind: input, shape index: {}]   ;;  %s860_s6 = inlined_call_operand.vmem [shape: f32[16,32], index: 6, kind: input, shape index: {}]   ;;  %s861_s7 = inlined_call_operand.hbm [shape: f32[2,80], index: 7, kind: output, shape index: {}]  }
   0x1   :  { %13 = vsyncpa [#allocation6], 0 }
   0x2   :  { %14 = vsyncpa [#allocation4], 0  ;;  %s686_s24 = smov [#allocation2]   ;;  %s614_s28 = scalar_lea.hbm %s856_s2, 256 }
   0x3   :  { %s24_s25 = sshll.u32 %s686_s24, 4  ;;  %p615_p0 = scmp.ne.s32.totalorder %s856_s2, %s614_s28  ;;  %s25_s25 = int_to_ptr.vmem [resolvable:$true] %s24_s25 }
   0x4   :  { %p618_p1 = scmp.lt.u32.totalorder %s614_s28, %s856_s2 }
   0x6   :  { %p620_p2 = pnand %p618_p1, %p615_p0 }
   0x8   :  { %623 = shalt.err (!%p620_p2)
}
   0x9   :  { %s624_s10 = scalar_lea.vmem %s25_s25, 256  ;;  %p629_p4 = scmp.lt.s32.totalorder %s25_s25, %s25_s25 }
   0xa   :  { %p625_p3 = scmp.ne.s32.totalorder %s25_s25, %s624_s10  ;;  %p630_p5 = scmp.lt.s32.totalorder %s624_s10, %s624_s10 }
   0xc   :  { %p631_p6 = por %p630_p5, %p629_p4 }
   0xe   :  { %p632_p7 = pnand %p631_p6, %p625_p3 }
  0x10   :  { %635 = shalt.err (!%p632_p7)
}
  0x11   :  { %s687_s11 = smov 128   ;;  %s688_s12 = smov 8  }
  0x12   :  { %30 = dma.hbm_to_vmem [thread:$0]  %s856_s2, 256, %s25_s25, [#allocation3], %s687_s11, %s687_s11, %s688_s12  }
  0x13   :  { %s689_s15 = smov [#allocation5]   ;;  %s636_s19 = scalar_lea.hbm %s859_s5, 16 }
  0x14   :  { %s41_s16 = sshll.u32 %s689_s15, 4  ;;  %p637_p8 = scmp.ne.s32.totalorder %s859_s5, %s636_s19  ;;  %s42_s16 = int_to_ptr.vmem [resolvable:$true] %s41_s16 }
  0x15   :  { %p640_p9 = scmp.lt.u32.totalorder %s636_s19, %s859_s5 }
  0x17   :  { %p642_p10 = pnand %p640_p9, %p637_p8 }
  0x19   :  { %645 = shalt.err (!%p642_p10)
}
  0x1a   :  { %s646_s24 = scalar_lea.vmem %s42_s16, 16  ;;  %s650_s2 = scalar_lea.vmem %s42_s16, 32 }
  0x1b   :  { %p647_p11 = scmp.ne.s32.totalorder %s42_s16, %s646_s24  ;;  %p651_p12 = scmp.lt.s32.totalorder %s42_s16, %s42_s16 }
  0x1c   :  { %p652_p13 = scmp.lt.s32.totalorder %s650_s2, %s646_s24 }
  0x1e   :  { %p653_p0 = por %p652_p13, %p651_p12 }
  0x20   :  { %p654_p1 = pnand %p653_p0, %p647_p11 }
  0x22   :  { %657 = shalt.err (!%p654_p1)
}
  0x23   :  { %44 = dma.hbm_to_vmem [thread:$0]  %s859_s5, 16, %s42_s16, [#allocation6]  }
  0x24   :  { %680 = dma.done.wait [#allocation3], 256  }
  0x25   :  { %681 = vsyncadd [#allocation3], 4294967040 }
  0x26   :  { %682 = dma.done.wait [#allocation6], 16  }
  0x27   :  { %683 = vsyncadd [#allocation6], 4294967280  ;;  %v690_v0 = vmov 0   ;;  %v691_v1 = vmov 0.0|0.0   ;;  %v768_v2 = vld [vmem:[%s854_s0] sm:$0x3]  ;;  %v189_v34 = vlaneseq }
  0x28   :  { %601 = vset.pattern.permute.xlu0 %v690_v0  ;;  %573 = vmatprep.subr.bf16.mxu0 %v691_v1  ;;  %v104_v3 = vld [vmem:[%s857_s3] sm:$0xff]  ;;  %v105_v4 = vld [vmem:[%s857_s3 + $0x8] sm:$0xff]  ;;  %v106_v6 = vld [vmem:[%s857_s3 + $0x10] sm:$0xff]  ;;  %vm692_vm0 = vmmov 0   ;;  %v693_v9 = vmov 0.0   ;;  %vm58_vm1 = vcmask 261120  }
  0x29   :  { %602 = vset.pattern.permute.xlu1 %v690_v0  ;;  %579 = vmatprep.subr.bf16.mxu1 %v691_v1  ;;  %v574_v5 = vpack.c.bf16 %v105_v4, %v104_v3  ;;  %v107_v7 = vld [vmem:[%s857_s3 + $0x18] sm:$0xff]  ;;  %v790_v10 = vld [vmem:[%s855_s1 + $0x8] sm:$0xff]  ;;  %v795_v11 = vld [vmem:[%s855_s1] sm:$0xff]  ;;  %vm111_vm2 = vcmask 1041409   ;;  %v694_v32 = vmov 1966171168  }
  0x2a   :  { %75 = vperm.xlu0 %601, %v768_v2   ;;  %v577_v8 = vpack.c.bf16 %v107_v7, %v106_v6  ;;  %552 = vmatprep.mubr.msk.f32.mxu0 %vm692_vm0, %v693_v9  ;;  %v66_v12 = vsel %vm58_vm1, %v790_v10, 0.0  ;;  %v59_v13 = vsel %vm58_vm1, %v795_v11, 0.0  ;;  %v187_v33 = vunpack.c.l.s4 %v694_v32  ;;  %s697_s2 = smov 64   ;;  %s698_s25 = smov [#allocation7]  }
  0x2b   :  { %575 = vmatpush3.bf16.msra.mxu0 %v574_v5  ;;  %563 = vmatprep.mubr.msk.f32.mxu1 %vm692_vm0, %v693_v9  ;;  %v67_v14 = vrot.slane %v66_v12, 4  ;;  %v60_v15 = vrot.slane %v59_v13, 4  ;;  %v190_v36 = vshrl.u32 %v189_v34, 7  ;;  %v229_v51 = vand.u32 127, %v189_v34  ;;  %s517_s26 = sshll.u32 %s698_s25, 4  ;;  %s518_s26 = int_to_ptr.vmem [resolvable:$true] %s517_s26 }
  0x2c   :  { %576 = vmatprep.subr.bf16.mxu0 %v691_v1  ;;  %v188_v35 = vunpack.c.0.s8 %v187_v33  ;;  %vm240_vm3 = vcmask 58368   ;;  %vm408_vm4 = vcmask 123904   ;;  %vm422_vm5 = vcmask 130048   ;;  %s658_s27 = scalar_lea.vmem %s518_s26, 32  ;;  %p663_p3 = scmp.lt.s32.totalorder %s518_s26, %s518_s26 }
  0x2d   :  { %v68_v16 = vadd.f32 %v67_v14, %v66_v12  ;;  %v61_v17 = vadd.f32 %v60_v15, %v59_v13  ;;  %v210_v41 = vsub.s32 0, %v190_v36  ;;  %v232_v52 = vsub.s32 %v229_v51, %v190_v36  ;;  %p659_p2 = scmp.ne.s32.totalorder %s518_s26, %s658_s27  ;;  %p664_p4 = scmp.lt.s32.totalorder %s658_s27, %s658_s27 }
  0x2e   :  { %v191_v37 = vsub.s32 %v188_v35, %v190_v36  ;;  %v251_v59 = vsub.s32 1, %v190_v36  ;;  %vm507_vm6 = vcmask 523264   ;;  %vm509_vm7 = vcmask 648192  }
  0x2f   :  { %578 = vmatpush3.bf16.msra.mxu0 %v577_v8  ;;  %v69_v18 = vrot.slane %v68_v16, 2  ;;  %v62_v19 = vrot.slane %v61_v17, 2  ;;  %p665_p5 = por %p664_p4, %p663_p3 }
  0x30   :  { %585 = vmatprep.subr.bf16.mxu0 %v691_v1 }
  0x31   :  { %v70_v20 = vadd.f32 %v69_v18, %v68_v16  ;;  %v63_v21 = vadd.f32 %v62_v19, %v61_v17  ;;  %p666_p6 = pnand %p665_p5, %p659_p2 }
  0x33   :  { %v71_v22 = vrot.slane %v70_v20, 1  ;;  %v64_v23 = vrot.slane %v63_v21, 1 }
  0x35   :  { %v72_v24 = vadd.f32 %v71_v22, %v70_v20  ;;  %v65_v26 = vadd.f32 %v64_v23, %v63_v21  ;;  %v322_v21 = vld [vmem:[%s858_s4] sm:$0xff]  ;;  %v323_v22 = vld [vmem:[%s858_s4 + $0x8] sm:$0xff] }
  0x36   :  { %v580_v23 = vpack.c.bf16 %v323_v22, %v322_v21 }
  0x38   :  { %581 = vmatpush3.bf16.msra.mxu1 %v580_v23 }
  0x39   :  { %582 = vmatprep.subr.bf16.mxu1 %v691_v1 }
  0xa9   :  { %v76_v25 = vpop.permute.xlu0 %75 }
  0xaa   :  { %v77_v27 = vrot.slane %v76_v25, 1  ;;  %v80_v29 = vmul.f32 %v76_v25, %v65_v26  ;;  %v325_v25 = vld [vmem:[%s858_s4 + $0x18] sm:$0xff] }
  0xac   :  { %v81_v28 = vmul.f32 %v77_v27, %v72_v24  ;;  %v324_v24 = vld [vmem:[%s858_s4 + $0x10] sm:$0xff] }
  0xad   :  { %v583_v26 = vpack.c.bf16 %v325_v25, %v324_v24 }
  0xae   :  { %v110_v30 = vrot.slane %v81_v28, 7 }
  0xaf   :  { %584 = vmatpush3.bf16.msra.mxu1 %v583_v26 }
  0xb0   :  { %v112_v31 = vsel %vm111_vm2, %v110_v30, %v80_v29 }
  0xb1   :  { %553 = vmatmul.mubr.msk.f32.vlgmr.msra.gmra.mrb[0].mxu0 %vm58_vm1, %v112_v31 }
  0xb2   :  { %570 = vmatprep.mubr.msk.f32.mxu0 %vm692_vm0, %v693_v9 }
 0x184   :  { %v181_v38 = vpop.f32.mrb[0].mxu0 }
 0x185   :  { %v192_v39 = vrot.slane %v181_v38, %v191_v37  ;;  %v554_v40 = vpop.f32.mrb[1].mxu0 }
 0x187   :  { %v193_v42 = vcombine.high %v192_v39, %v192_v39  ;;  %v200_v43 = vrot.slane %v192_v39, %v191_v37 }
 0x189   :  { %v207_v44 = vrot.slane %v193_v42, %v191_v37  ;;  %v211_v45 = vrot.slane %v200_v43, %v210_v41 }
 0x18b   :  { %v218_v46 = vmul.f32 %v211_v45, %v795_v11  ;;  %v215_v47 = vrot.slane %v207_v44, %v210_v41  ;;  %v528_v44 = vld [vmem:[#allocation5] ss:$0 sm:$0xff] }
 0x18d   :  { %v220_v48 = vsel %vm58_vm1, %v218_v46, 0.0  ;;  %v219_v49 = vmul.f32 %v215_v47, %v790_v10 }
 0x18e   :  { %221 = vadd.xlane.f32.xlu0 %v220_v48  ;;  %v695_v48 = vmov 1  }
 0x18f   :  { %v223_v50 = vsel %vm58_vm1, %v219_v49, 0.0 }
 0x190   :  { %224 = vadd.xlane.f32.xlu1 %v223_v50 }
 0x21b   :  { %v222_v53 = vpop.xlane.xlu0 %221 }
 0x21c   :  { %v233_v55 = vrot.slane %v222_v53, %v232_v52 }
 0x21d   :  { %v225_v54 = vpop.xlane.xlu1 %224 }
 0x21e   :  { %v237_v56 = vrot.slane %v225_v54, %v232_v52 }
 0x220   :  { %v238_v57 = vsel %vm111_vm2, %v237_v56, %v233_v55  ;;  %v421_v55 = vld [vmem:[%s860_s6 + $0x8] sm:$0xff] }
 0x221   :  { %v241_v58 = vsel %vm240_vm3, %v238_v57, -inf  ;;  %v55_v57 = vld [vmem:[#allocation2] sm:$0xff] }
 0x222   :  { %242 = vmax.xlane.f32.xlu1 %v241_v58  ;;  %v56_v58 = vld [vmem:[#allocation2 + $0x8] sm:$0xff] }
 0x2af   :  { %v243_v60 = vpop.xlane.xlu1 %242 }
 0x2b0   :  { %v248_v61 = vrot.slane %v243_v60, %v210_v41  ;;  %v252_v62 = vrot.slane %v243_v60, %v251_v59  ;;  %v89_v60 = vsel %vm58_vm1, %v56_v58, 0.0 }
 0x2b2   :  { %v255_v63 = vsub.f32 %v222_v53, %v248_v61  ;;  %v256_v0 = vsub.f32 %v225_v54, %v252_v62  ;;  %v420_v54 = vld [vmem:[%s860_s6] sm:$0xff]  ;;  %v90_v62 = vrot.slane %v89_v60, 4  ;;  %s696_s6 = smov 32  }
 0x2b3   :  { %v586_v56 = vpack.c.bf16 %v421_v55, %v420_v54 }
 0x2b4   :  { %v257_v3 = vmul.f32 1.442695, %v255_v63  ;;  %v259_v4 = vmul.f32 1.442695, %v256_v0 }
 0x2b5   :  { %587 = vmatpush3.bf16.msra.mxu0 %v586_v56 }
 0x2b6   :  { %604 = vpow2.f32 %v257_v3 }
 0x2b7   :  { %606 = vpow2.f32 %v259_v4 }
 0x2c0   :  { %v605_v5 = vpop.eup %604 }
 0x2c1   :  { %264 = vperm.xlu1 %602, %v605_v5   ;;  %v607_v6 = vpop.eup %606 }
 0x2c5   :  { %267 = vperm.xlu1 %602, %v607_v6  }
 0x2c9   :  { %603 = vset.pattern.permute.xlu1 %v695_v48 }
 0x340   :  { %v265_v7 = vpop.permute.xlu1 %264 }
 0x341   :  { %v272_v9 = vrot.slane %v265_v7, %v232_v52 }
 0x344   :  { %v268_v8 = vpop.permute.xlu1 %267 }
 0x345   :  { %v276_v12 = vrot.slane %v268_v8, %v232_v52 }
 0x347   :  { %v277_v13 = vsel %vm111_vm2, %v276_v12, %v272_v9 }
 0x348   :  { %v279_v14 = vsel %vm240_vm3, %v277_v13, 0.0 }
 0x349   :  { %280 = vadd.xlane.f32.xlu1 %v279_v14 }
 0x3d6   :  { %v281_v15 = vpop.xlane.xlu1 %280 }
 0x3d7   :  { %608 = vrcp.f32 %v281_v15 }
 0x3e1   :  { %v609_v16 = vpop.eup %608 }
 0x3e2   :  { %v287_v17 = vrot.slane %v609_v16, %v210_v41  ;;  %v291_v19 = vrot.slane %v609_v16, %v251_v59  ;;  %v82_v59 = vsel %vm58_vm1, %v55_v57, 0.0 }
 0x3e3   :  { %v83_v61 = vrot.slane %v82_v59, 4 }
 0x3e4   :  { %v294_v18 = vmul.f32 %v605_v5, %v287_v17  ;;  %v295_v20 = vmul.f32 %v607_v6, %v291_v19 }
 0x3e5   :  { %v84_v63 = vadd.f32 %v83_v61, %v82_v59 }
 0x3e6   :  { %298 = vperm.xlu0 %601, %v294_v18  }
 0x3e7   :  { %v85_v0 = vrot.slane %v84_v63, 2 }
 0x3e9   :  { %v86_v4 = vadd.f32 %v85_v0, %v84_v63 }
 0x3ea   :  { %303 = vperm.xlu0 %601, %v295_v20  }
 0x3eb   :  { %v87_v6 = vrot.slane %v86_v4, 1 }
 0x3ed   :  { %v88_v9 = vadd.f32 %v87_v6, %v86_v4 }
 0x465   :  { %v299_v27 = vpop.permute.xlu0 %298 }
 0x466   :  { %v306_v28 = vmul.f32 %v299_v27, %v795_v11 }
 0x468   :  { %v308_v29 = vsel %vm58_vm1, %v306_v28, 0.0 }
 0x469   :  { %v309_v30 = vrot.slane %v308_v29, 4  ;;  %v304_v31 = vpop.permute.xlu0 %303 }
 0x46a   :  { %v307_v32 = vmul.f32 %v304_v31, %v790_v10 }
 0x46b   :  { %v310_v1 = vadd.f32 %v309_v30, %v308_v29 }
 0x46c   :  { %v315_v33 = vsel %vm58_vm1, %v307_v32, 0.0 }
 0x46d   :  { %v311_v34 = vrot.slane %v310_v1, 2  ;;  %v316_v35 = vrot.slane %v315_v33, 4 }
 0x46f   :  { %v312_v36 = vadd.f32 %v311_v34, %v310_v1  ;;  %v317_v37 = vadd.f32 %v316_v35, %v315_v33 }
 0x471   :  { %v318_v38 = vrot.slane %v317_v37, 2  ;;  %v313_v39 = vrot.slane %v312_v36, 1 }
 0x473   :  { %v319_v40 = vadd.f32 %v318_v38, %v317_v37  ;;  %v314_v42 = vadd.f32 %v313_v39, %v312_v36 }
 0x475   :  { %v320_v41 = vrot.slane %v319_v40, 1 }
 0x477   :  { %v321_v43 = vadd.f32 %v320_v41, %v319_v40 }
 0x479   :  { %v335_v11 = vsel %vm111_vm2, %v321_v43, %v314_v42 }
 0x47a   :  { %564 = vmatmul.mubr.msk.f32.vlgmr.msra.gmra.mrb[0].mxu1 %vm58_vm1, %v335_v11 }
 0x54d   :  { %v404_v45 = vpop.f32.mrb[0].mxu1 }
 0x54e   :  { %v405_v10 = vadd.f32 %v528_v44, %v404_v45  ;;  %v565_v46 = vpop.f32.mrb[1].mxu1 }
 0x550   :  { %v409_v47 = vsel %vm408_vm4, %v405_v10, -inf }
 0x551   :  { %410 = vmax.xlane.f32.xlu0 %v409_v47 }
 0x5de   :  { %v411_v49 = vpop.xlane.xlu0 %410 }
 0x5df   :  { %v412_v50 = vsub.f32 %v405_v10, %v411_v49 }
 0x5e1   :  { %v413_v51 = vmul.f32 1.442695, %v412_v50 }
 0x5e3   :  { %610 = vpow2.f32 %v413_v51 }
 0x5ed   :  { %v611_v52 = vpop.eup %610 }
 0x5ee   :  { %v415_v53 = vsel %vm408_vm4, %v611_v52, 0.0 }
 0x5ef   :  { %416 = vadd.xlane.f32.xlu1 %v415_v53 }
 0x600   :  { %97 = vperm.xlu1 %603, %v768_v2   ;;  %v91_v2 = vadd.f32 %v90_v62, %v89_v60 }
 0x602   :  { %v92_v3 = vrot.slane %v91_v2, 2 }
 0x604   :  { %v93_v5 = vadd.f32 %v92_v3, %v91_v2 }
 0x606   :  { %v94_v7 = vrot.slane %v93_v5, 1 }
 0x608   :  { %v95_v12 = vadd.f32 %v94_v7, %v93_v5 }
 0x67c   :  { %v417_v8 = vpop.xlane.xlu1 %416 }
 0x67d   :  { %612 = vrcp.f32 %v417_v8 }
 0x680   :  { %v98_v13 = vpop.permute.xlu1 %97 }
 0x681   :  { %v99_v14 = vrot.slane %v98_v13, 1  ;;  %v102_v15 = vmul.f32 %v98_v13, %v88_v9 }
 0x683   :  { %v103_v16 = vmul.f32 %v99_v14, %v95_v12 }
 0x685   :  { %v498_v17 = vrot.slane %v103_v16, 7 }
 0x687   :  { %v613_v18 = vpop.eup %612  ;;  %v499_v19 = vsel %vm111_vm2, %v498_v17, %v102_v15 }
 0x688   :  { %v419_v20 = vmul.f32 %v613_v18, %v611_v52  ;;  %500 = vrot.lane.b32.xlu1 %v499_v19, %s696_s6 }
 0x68a   :  { %571 = vmatmul.mubr.msk.f32.vlgmr.msra.gmra.mrb[2].mxu0 %vm422_vm5, %v419_v20 }
 0x68c   :  { %503 = vrot.lane.b32.xlu1 %v419_v20, %s697_s2 }
 0x6fa   :  { %v501_v21 = vpop.permute.xlu1 %500 }
 0x6fe   :  { %v504_v23 = vpop.permute.xlu1 %503 }
 0x75d   :  { %v492_v22 = vpop.f32.mrb[2].mxu0 }
 0x75e   :  { %v506_v24 = vsel %vm58_vm1, %v492_v22, %v501_v21  ;;  %v572_v25 = vpop.f32.mrb[3].mxu0 }
 0x75f   :  { %v508_v26 = vsel %vm507_vm6, %v506_v24, %v504_v23 }
 0x760   :  { %510 = vst.msk [vmem:[#allocation7] sm:$0x3] %vm509_vm7, %v508_v26 }
 0x761   :  { %669 = shalt.err (!%p666_p6)
}
 0x762   :  { %s670_s29 = scalar_lea.hbm %s861_s7, 32 }
 0x763   :  { %p671_p7 = scmp.ne.s32.totalorder %s861_s7, %s670_s29  ;;  %p674_p8 = scmp.lt.u32.totalorder %s670_s29, %s861_s7 }
 0x765   :  { %p676_p9 = pnand %p674_p8, %p671_p7 }
 0x767   :  { %679 = shalt.err (!%p676_p9)
}
 0x768   :  { %520 = dma.vmem_to_hbm [thread:$0]  %s518_s26, 32, %s861_s7, [#allocation4]  }
 0x769   :  { %684 = dma.done.wait [#allocation4], 32  }
 0x76a   :  { %685 = vsyncadd [#allocation4], 4294967264 }
 0x76b   :  { %524 = vsyncpa [#allocation3], 1 }
 0x76c   :  { %525 = vsyncpa [#allocation6], 1 }
 0x76d   :  { %526 = vsyncpa [#allocation4], 1 }

</bundles_post_ra>
